<compile_context>
chip_gen: v7x
topology: tpu7x:2x2x1
jax: 0.10.0
libtpu: 0.0.40
codegen_flags: <defaults>
</compile_context>

<pallas_src>
import jax
import jax.numpy as jnp
from jax.experimental import pallas as pl
from jax.experimental.pallas import tpu as pltpu  # noqa: F401  (TPU backend)

# ----------------------- module configuration (small) -----------------------
HIDDEN = 128
NUM_HEADS = 4
NUM_KV_HEADS = 2
HEAD_DIM = HIDDEN // NUM_HEADS             # 32  (module default head_dim)
SEQ = 8                                    # tokens (single causal sequence)
ROPE_THETA = 10000.0
PARTIAL_ROTARY = 0.5
ROT_DIM = int(HEAD_DIM * PARTIAL_ROTARY)   # 16
HALF_ROT = ROT_DIM // 2                    # 8
RMS_EPS = 1e-5
USE_QK_NORM = True                         # exercise the q_norm / k_norm path
Q_SIZE = NUM_HEADS * HEAD_DIM              # 128
KV_SIZE = NUM_KV_HEADS * HEAD_DIM          # 64
QK_WIDTH = Q_SIZE + KV_SIZE                # 192 (q heads | k heads)
QKV_OUT = Q_SIZE + 2 * KV_SIZE             # 256
SCALE = HEAD_DIM ** -0.5
GROUP = NUM_HEADS // NUM_KV_HEADS          # GQA group size


# ------------------------------ fused kernel --------------------------------
def fused_attn_kernel(x_ref, w_qkv_ref, b_qkv_ref, gamma_ref, seg_ref, rot_ref,
                      cos_ref, sin_ref, w_o_ref, o_ref):
    t = x_ref.shape[0]

    # 1) fused QKV projection (matmul + bias), token-major, lane-dense.
    qkv = jnp.dot(x_ref[...], w_qkv_ref[...],
                  preferred_element_type=jnp.float32) + b_qkv_ref[...]
    qk = qkv[:, :QK_WIDTH]                 # (t, 192) : q heads | k heads
    v = qkv[:, QK_WIDTH:]                  # (t, 64)

    # 2) per-head RMSNorm (q_norm / k_norm) as a block-diagonal matmul:
    #    mean-of-squares per 32-lane head segment, no reshapes.
    if USE_QK_NORM:
        mean_sq = jnp.dot(qk * qk, seg_ref[...],
                          preferred_element_type=jnp.float32)
        qk = qk * jax.lax.rsqrt(mean_sq + RMS_EPS) * gamma_ref[...]

    # 3) partial neox RoPE, full-width:  x*COS + (x @ R)*SIN.
    #    COS=1 / SIN=0 on the pass-through dims; the half-rotate pairing and
    #    sign are folded into the constant matrix R -> one dense result.
    qk = qk * cos_ref[...] + jnp.dot(qk, rot_ref[...],
                                     preferred_element_type=jnp.float32) * sin_ref[...]
    q = qk[:, :Q_SIZE]                     # (t, 128)
    k = qk[:, Q_SIZE:]                     # (t, 64)

    # 4) causal GQA attention + o_proj, all heads in one invocation.
    row = jax.lax.broadcasted_iota(jnp.int32, (t, t), 0)
    col = jax.lax.broadcasted_iota(jnp.int32, (t, t), 1)
    causal = col <= row
    w_o = w_o_ref[...]

    acc = jnp.zeros((t, HIDDEN), jnp.float32)
    for h in range(NUM_HEADS):             # static, fully unrolled
        g = h // GROUP
        q_h = q[:, h * HEAD_DIM:(h + 1) * HEAD_DIM]
        k_h = k[:, g * HEAD_DIM:(g + 1) * HEAD_DIM]
        v_h = v[:, g * HEAD_DIM:(g + 1) * HEAD_DIM]
        s = jnp.dot(q_h, k_h.T, preferred_element_type=jnp.float32) * SCALE
        s = jnp.where(causal, s, -1e30)
        m = jnp.max(s, axis=-1, keepdims=True)
        p = jnp.exp(s - m)
        l = jnp.sum(p, axis=-1, keepdims=True)
        o_h = jnp.dot(p, v_h, preferred_element_type=jnp.float32)
        o_h = o_h * pl.reciprocal(l, approx=True)     # EUP, not VPU divide
        # o_proj folded per head: avoids a lane concat of the head outputs.
        acc = acc + jnp.dot(o_h, w_o[h * HEAD_DIM:(h + 1) * HEAD_DIM, :],
                            preferred_element_type=jnp.float32)

    o_ref[...] = acc                       # single dense (t, 128) store


# ------------------------------- glue / wrapper ------------------------------
def _norm_rope_constants():
    """Block-diag mean matrix (SEG) and RoPE rotation matrix (R), (192, 192)."""
    idx = jnp.arange(QK_WIDTH)
    same_head = (idx[:, None] // HEAD_DIM) == (idx[None, :] // HEAD_DIM)
    seg = jnp.where(same_head, 1.0 / HEAD_DIM, 0.0).astype(jnp.float32)
    ih = idx[:, None] % HEAD_DIM
    jh = idx[None, :] % HEAD_DIM
    neg = same_head & (jh < HALF_ROT) & (ih == jh + HALF_ROT)
    pos = same_head & (jh >= HALF_ROT) & (jh < ROT_DIM) & (ih == jh - HALF_ROT)
    rot = jnp.where(neg, -1.0, jnp.where(pos, 1.0, 0.0)).astype(jnp.float32)
    return seg, rot


def _rope_tables(positions):
    """Full-width cos/sin tables (T, QK_WIDTH): cos=1 / sin=0 past ROT_DIM."""
    inv_freq = 1.0 / (ROPE_THETA ** (
        jnp.arange(0, ROT_DIM, 2, dtype=jnp.float32) / ROT_DIM))
    freqs = positions.astype(jnp.float32)[:, None] * inv_freq[None, :]  # (T, 8)
    t = freqs.shape[0]
    cos_h = jnp.concatenate(
        [jnp.cos(freqs), jnp.cos(freqs),
         jnp.ones((t, HEAD_DIM - ROT_DIM), jnp.float32)], axis=-1)      # (T, 32)
    sin_h = jnp.concatenate(
        [jnp.sin(freqs), jnp.sin(freqs),
         jnp.zeros((t, HEAD_DIM - ROT_DIM), jnp.float32)], axis=-1)
    n_blocks = NUM_HEADS + NUM_KV_HEADS
    return jnp.tile(cos_h, (1, n_blocks)), jnp.tile(sin_h, (1, n_blocks))


@jax.jit
def glm4_moe_attention(positions, hidden_states, params):
    x = hidden_states.astype(jnp.float32)
    t = x.shape[0]
    cos, sin = _rope_tables(positions)
    seg, rot = _norm_rope_constants()
    gamma = jnp.concatenate(
        [jnp.tile(params["q_norm_w"], NUM_HEADS),
         jnp.tile(params["k_norm_w"], NUM_KV_HEADS)])[None, :]          # (1, 192)

    return pl.pallas_call(
        fused_attn_kernel,
        out_shape=jax.ShapeDtypeStruct((t, HIDDEN), jnp.float32),
    )(x, params["w_qkv"], params["b_qkv"][None, :], gamma, seg, rot,
      cos, sin, params["w_o"])


# --------------------------- pure-JAX reference ------------------------------
def reference(positions, hidden_states, params):
    x = hidden_states.astype(jnp.float32)
    T = x.shape[0]
    qkv = x @ params["w_qkv"] + params["b_qkv"]
    q, k, v = jnp.split(qkv, [Q_SIZE, Q_SIZE + KV_SIZE], axis=-1)

    def rms(xf, w):
        xr = xf.reshape(-1, HEAD_DIM)
        var = jnp.mean(xr * xr, axis=-1, keepdims=True)
        return (xr * jax.lax.rsqrt(var + RMS_EPS) * w).reshape(xf.shape)

    if USE_QK_NORM:
        q = rms(q, params["q_norm_w"])
        k = rms(k, params["k_norm_w"])

    inv_freq = 1.0 / (ROPE_THETA ** (
        jnp.arange(0, ROT_DIM, 2, dtype=jnp.float32) / ROT_DIM))
    freqs = positions.astype(jnp.float32)[:, None] * inv_freq[None, :]
    cos, sin = jnp.cos(freqs), jnp.sin(freqs)

    def rope(xf, n_heads):
        xh = xf.reshape(T, n_heads, HEAD_DIM)
        x1 = xh[..., :HALF_ROT]
        x2 = xh[..., HALF_ROT:ROT_DIM]
        rest = xh[..., ROT_DIM:]
        c = cos[:, None, :]
        s = sin[:, None, :]
        out = jnp.concatenate([x1 * c - x2 * s, x2 * c + x1 * s, rest], axis=-1)
        return out.reshape(T, n_heads * HEAD_DIM)

    q = rope(q, NUM_HEADS)
    k = rope(k, NUM_KV_HEADS)

    qh = q.reshape(T, NUM_HEADS, HEAD_DIM).transpose(1, 0, 2)
    kh = jnp.repeat(k.reshape(T, NUM_KV_HEADS, HEAD_DIM).transpose(1, 0, 2),
                    GROUP, axis=0)
    vh = jnp.repeat(v.reshape(T, NUM_KV_HEADS, HEAD_DIM).transpose(1, 0, 2),
                    GROUP, axis=0)

    s = jnp.einsum("htd,hsd->hts", qh, kh) * SCALE
    mask = jnp.tril(jnp.ones((T, T), dtype=bool))
    s = jnp.where(mask[None], s, -1e30)
    p = jax.nn.softmax(s, axis=-1)
    o = jnp.einsum("hts,hsd->htd", p, vh).transpose(1, 0, 2).reshape(T, Q_SIZE)
    return o @ params["w_o"]


# ------------------------------------ main -----------------------------------
if __name__ == "__main__":
    key = jax.random.PRNGKey(0)
    k1, k2, k3, k4, k5, k6 = jax.random.split(key, 6)

    params = {
        "w_qkv": jax.random.normal(k1, (HIDDEN, QKV_OUT), jnp.float32) * 0.05,
        "b_qkv": jax.random.normal(k2, (QKV_OUT,), jnp.float32) * 0.05,
        "w_o": jax.random.normal(k3, (Q_SIZE, HIDDEN), jnp.float32) * 0.05,
        "q_norm_w": 1.0 + 0.1 * jax.random.normal(k4, (HEAD_DIM,), jnp.float32),
        "k_norm_w": 1.0 + 0.1 * jax.random.normal(k5, (HEAD_DIM,), jnp.float32),
    }

    hidden_states = jax.random.normal(k6, (SEQ, HIDDEN), jnp.float32)
    positions = jnp.arange(SEQ, dtype=jnp.int32)

    out = jax.block_until_ready(glm4_moe_attention(positions, hidden_states, params))
    ref = jax.block_until_ready(reference(positions, hidden_states, params))

    assert out.shape == (SEQ, HIDDEN)
    # tolerance loosened slightly (f32 would be ~1e-6) for the EUP approximate
    # reciprocal used in the softmax normalization.
    assert jnp.allclose(out, ref, atol=2e-3, rtol=2e-3), (
        f"max abs err {jnp.max(jnp.abs(out - ref))}"
    )
    print("KERNEL_OK")
</pallas_src>

<mosaic_0001>
module attributes {stable_mosaic.version = 11 : i64} {
  func.func @fused_attn_kernel(%arg0: memref<8x128xf32, #tpu.memory_space<vmem>>, %arg1: memref<128x256xf32, #tpu.memory_space<vmem>>, %arg2: memref<1x256xf32, #tpu.memory_space<vmem>>, %arg3: memref<1x192xf32, #tpu.memory_space<vmem>>, %arg4: memref<192x192xf32, #tpu.memory_space<vmem>>, %arg5: memref<192x192xf32, #tpu.memory_space<vmem>>, %arg6: memref<8x192xf32, #tpu.memory_space<vmem>>, %arg7: memref<8x192xf32, #tpu.memory_space<vmem>>, %arg8: memref<128x128xf32, #tpu.memory_space<vmem>>, %arg9: memref<8x128xf32, #tpu.memory_space<vmem>>) attributes {dimension_semantics = [], scalar_prefetch = 0 : i64, scratch_operands = 0 : i64, tpu.core_type = #tpu.core_type<tc>} {
    %c0 = arith.constant 0 : index
    %c0_0 = arith.constant 0 : index
    %0 = vector.load %arg0[%c0, %c0_0] : memref<8x128xf32, #tpu.memory_space<vmem>>, vector<8x128xf32>
    %c0_1 = arith.constant 0 : index
    %c0_2 = arith.constant 0 : index
    %1 = vector.load %arg1[%c0_1, %c0_2] : memref<128x256xf32, #tpu.memory_space<vmem>>, vector<128x256xf32>
    %cst = arith.constant dense<0.000000e+00> : vector<8x256xf32>
    %2 = tpu.matmul %0, %1, %cst {dimension_numbers = #tpu.dot_dimension_numbers<[1], [0], [0], [1], [0, 0, 1, 1], [], []>} : vector<8x128xf32>, vector<128x256xf32>, vector<8x256xf32> -> vector<8x256xf32>
    %c0_3 = arith.constant 0 : index
    %c0_4 = arith.constant 0 : index
    %3 = vector.load %arg2[%c0_3, %c0_4] : memref<1x256xf32, #tpu.memory_space<vmem>>, vector<1x256xf32>
    %4 = vector.broadcast %3 : vector<1x256xf32> to vector<8x256xf32>
    %5 = arith.addf %2, %4 : vector<8x256xf32>
    %6 = vector.extract_strided_slice %5 {offsets = [0, 0], sizes = [8, 192], strides = [1, 1]} : vector<8x256xf32> to vector<8x192xf32>
    %7 = vector.extract_strided_slice %5 {offsets = [0, 192], sizes = [8, 64], strides = [1, 1]} : vector<8x256xf32> to vector<8x64xf32>
    %8 = arith.mulf %6, %6 : vector<8x192xf32>
    %c0_5 = arith.constant 0 : index
    %c0_6 = arith.constant 0 : index
    %9 = vector.load %arg4[%c0_5, %c0_6] : memref<192x192xf32, #tpu.memory_space<vmem>>, vector<192x192xf32>
    %cst_7 = arith.constant dense<0.000000e+00> : vector<8x192xf32>
    %10 = tpu.matmul %8, %9, %cst_7 {dimension_numbers = #tpu.dot_dimension_numbers<[1], [0], [0], [1], [0, 0, 1, 1], [], []>} : vector<8x192xf32>, vector<192x192xf32>, vector<8x192xf32> -> vector<8x192xf32>
    %cst_8 = arith.constant 9.99999974E-6 : f32
    %11 = vector.broadcast %cst_8 : f32 to vector<8x192xf32>
    %12 = arith.addf %10, %11 : vector<8x192xf32>
    %13 = math.rsqrt %12 : vector<8x192xf32>
    %14 = arith.mulf %6, %13 : vector<8x192xf32>
    %c0_9 = arith.constant 0 : index
    %c0_10 = arith.constant 0 : index
    %15 = vector.load %arg3[%c0_9, %c0_10] : memref<1x192xf32, #tpu.memory_space<vmem>>, vector<1x192xf32>
    %16 = vector.broadcast %15 : vector<1x192xf32> to vector<8x192xf32>
    %17 = arith.mulf %14, %16 : vector<8x192xf32>
    %c0_11 = arith.constant 0 : index
    %c0_12 = arith.constant 0 : index
    %18 = vector.load %arg6[%c0_11, %c0_12] : memref<8x192xf32, #tpu.memory_space<vmem>>, vector<8x192xf32>
    %19 = arith.mulf %17, %18 : vector<8x192xf32>
    %c0_13 = arith.constant 0 : index
    %c0_14 = arith.constant 0 : index
    %20 = vector.load %arg5[%c0_13, %c0_14] : memref<192x192xf32, #tpu.memory_space<vmem>>, vector<192x192xf32>
    %cst_15 = arith.constant dense<0.000000e+00> : vector<8x192xf32>
    %21 = tpu.matmul %17, %20, %cst_15 {dimension_numbers = #tpu.dot_dimension_numbers<[1], [0], [0], [1], [0, 0, 1, 1], [], []>} : vector<8x192xf32>, vector<192x192xf32>, vector<8x192xf32> -> vector<8x192xf32>
    %c0_16 = arith.constant 0 : index
    %c0_17 = arith.constant 0 : index
    %22 = vector.load %arg7[%c0_16, %c0_17] : memref<8x192xf32, #tpu.memory_space<vmem>>, vector<8x192xf32>
    %23 = arith.mulf %21, %22 : vector<8x192xf32>
    %24 = arith.addf %19, %23 : vector<8x192xf32>
    %25 = vector.extract_strided_slice %24 {offsets = [0, 0], sizes = [8, 128], strides = [1, 1]} : vector<8x192xf32> to vector<8x128xf32>
    %26 = vector.extract_strided_slice %24 {offsets = [0, 128], sizes = [8, 64], strides = [1, 1]} : vector<8x192xf32> to vector<8x64xf32>
    %27 = tpu.iota {dimensions = array<i32: 0>} : vector<8x8xi32>
    %28 = tpu.iota {dimensions = array<i32: 1>} : vector<8x8xi32>
    %29 = arith.cmpi sle, %28, %27 : vector<8x8xi32>
    %c0_18 = arith.constant 0 : index
    %c0_19 = arith.constant 0 : index
    %30 = vector.load %arg8[%c0_18, %c0_19] : memref<128x128xf32, #tpu.memory_space<vmem>>, vector<128x128xf32>
    %cst_20 = arith.constant 0.000000e+00 : f32
    %31 = vector.broadcast %cst_20 : f32 to vector<8x128xf32>
    %32 = vector.extract_strided_slice %25 {offsets = [0, 0], sizes = [8, 32], strides = [1, 1]} : vector<8x128xf32> to vector<8x32xf32>
    %33 = vector.extract_strided_slice %26 {offsets = [0, 0], sizes = [8, 32], strides = [1, 1]} : vector<8x64xf32> to vector<8x32xf32>
    %34 = vector.extract_strided_slice %7 {offsets = [0, 0], sizes = [8, 32], strides = [1, 1]} : vector<8x64xf32> to vector<8x32xf32>
    %35 = tpu.transpose %33, [1, 0] : vector<8x32xf32> -> vector<32x8xf32>
    %cst_21 = arith.constant dense<0.000000e+00> : vector<8x8xf32>
    %36 = tpu.matmul %32, %35, %cst_21 {dimension_numbers = #tpu.dot_dimension_numbers<[1], [0], [0], [1], [0, 0, 1, 1], [], []>} : vector<8x32xf32>, vector<32x8xf32>, vector<8x8xf32> -> vector<8x8xf32>
    %cst_22 = arith.constant 0.176776692 : f32
    %37 = vector.broadcast %cst_22 : f32 to vector<8x8xf32>
    %38 = arith.mulf %36, %37 : vector<8x8xf32>
    %cst_23 = arith.constant -1.000000e+30 : f32
    %39 = vector.broadcast %cst_23 : f32 to vector<8x8xf32>
    %40 = arith.select %29, %38, %39 : vector<8x8xi1>, vector<8x8xf32>
    %cst_24 = arith.constant dense<0xFF800000> : vector<8xf32>
    %41 = vector.multi_reduction <maximumf>, %40, %cst_24 [1] : vector<8x8xf32> to vector<8xf32>
    %42 = vector.shape_cast %41 : vector<8xf32> to vector<8x1xf32>
    %43 = vector.broadcast %42 : vector<8x1xf32> to vector<8x8xf32>
    %44 = arith.subf %40, %43 : vector<8x8xf32>
    %45 = math.exp %44 : vector<8x8xf32>
    %cst_25 = arith.constant dense<0.000000e+00> : vector<8xf32>
    %46 = vector.multi_reduction <add>, %45, %cst_25 [1] : vector<8x8xf32> to vector<8xf32>
    %47 = vector.shape_cast %46 : vector<8xf32> to vector<8x1xf32>
    %cst_26 = arith.constant dense<0.000000e+00> : vector<8x32xf32>
    %48 = tpu.matmul %45, %34, %cst_26 {dimension_numbers = #tpu.dot_dimension_numbers<[1], [0], [0], [1], [0, 0, 1, 1], [], []>} : vector<8x8xf32>, vector<8x32xf32>, vector<8x32xf32> -> vector<8x32xf32>
    %49 = tpu.reciprocal %47 {approx = true} : vector<8x1xf32> -> vector<8x1xf32>
    %50 = vector.broadcast %49 : vector<8x1xf32> to vector<8x32xf32>
    %51 = arith.mulf %48, %50 : vector<8x32xf32>
    %52 = vector.extract_strided_slice %30 {offsets = [0, 0], sizes = [32, 128], strides = [1, 1]} : vector<128x128xf32> to vector<32x128xf32>
    %cst_27 = arith.constant dense<0.000000e+00> : vector<8x128xf32>
    %53 = tpu.matmul %51, %52, %cst_27 {dimension_numbers = #tpu.dot_dimension_numbers<[1], [0], [0], [1], [0, 0, 1, 1], [], []>} : vector<8x32xf32>, vector<32x128xf32>, vector<8x128xf32> -> vector<8x128xf32>
    %54 = arith.addf %31, %53 : vector<8x128xf32>
    %55 = vector.extract_strided_slice %25 {offsets = [0, 32], sizes = [8, 32], strides = [1, 1]} : vector<8x128xf32> to vector<8x32xf32>
    %56 = vector.extract_strided_slice %26 {offsets = [0, 0], sizes = [8, 32], strides = [1, 1]} : vector<8x64xf32> to vector<8x32xf32>
    %57 = vector.extract_strided_slice %7 {offsets = [0, 0], sizes = [8, 32], strides = [1, 1]} : vector<8x64xf32> to vector<8x32xf32>
    %58 = tpu.transpose %56, [1, 0] : vector<8x32xf32> -> vector<32x8xf32>
    %cst_28 = arith.constant dense<0.000000e+00> : vector<8x8xf32>
    %59 = tpu.matmul %55, %58, %cst_28 {dimension_numbers = #tpu.dot_dimension_numbers<[1], [0], [0], [1], [0, 0, 1, 1], [], []>} : vector<8x32xf32>, vector<32x8xf32>, vector<8x8xf32> -> vector<8x8xf32>
    %cst_29 = arith.constant 0.176776692 : f32
    %60 = vector.broadcast %cst_29 : f32 to vector<8x8xf32>
    %61 = arith.mulf %59, %60 : vector<8x8xf32>
    %cst_30 = arith.constant -1.000000e+30 : f32
    %62 = vector.broadcast %cst_30 : f32 to vector<8x8xf32>
    %63 = arith.select %29, %61, %62 : vector<8x8xi1>, vector<8x8xf32>
    %cst_31 = arith.constant dense<0xFF800000> : vector<8xf32>
    %64 = vector.multi_reduction <maximumf>, %63, %cst_31 [1] : vector<8x8xf32> to vector<8xf32>
    %65 = vector.shape_cast %64 : vector<8xf32> to vector<8x1xf32>
    %66 = vector.broadcast %65 : vector<8x1xf32> to vector<8x8xf32>
    %67 = arith.subf %63, %66 : vector<8x8xf32>
    %68 = math.exp %67 : vector<8x8xf32>
    %cst_32 = arith.constant dense<0.000000e+00> : vector<8xf32>
    %69 = vector.multi_reduction <add>, %68, %cst_32 [1] : vector<8x8xf32> to vector<8xf32>
    %70 = vector.shape_cast %69 : vector<8xf32> to vector<8x1xf32>
    %cst_33 = arith.constant dense<0.000000e+00> : vector<8x32xf32>
    %71 = tpu.matmul %68, %57, %cst_33 {dimension_numbers = #tpu.dot_dimension_numbers<[1], [0], [0], [1], [0, 0, 1, 1], [], []>} : vector<8x8xf32>, vector<8x32xf32>, vector<8x32xf32> -> vector<8x32xf32>
    %72 = tpu.reciprocal %70 {approx = true} : vector<8x1xf32> -> vector<8x1xf32>
    %73 = vector.broadcast %72 : vector<8x1xf32> to vector<8x32xf32>
    %74 = arith.mulf %71, %73 : vector<8x32xf32>
    %75 = vector.extract_strided_slice %30 {offsets = [32, 0], sizes = [32, 128], strides = [1, 1]} : vector<128x128xf32> to vector<32x128xf32>
    %cst_34 = arith.constant dense<0.000000e+00> : vector<8x128xf32>
    %76 = tpu.matmul %74, %75, %cst_34 {dimension_numbers = #tpu.dot_dimension_numbers<[1], [0], [0], [1], [0, 0, 1, 1], [], []>} : vector<8x32xf32>, vector<32x128xf32>, vector<8x128xf32> -> vector<8x128xf32>
    %77 = arith.addf %54, %76 : vector<8x128xf32>
    %78 = vector.extract_strided_slice %25 {offsets = [0, 64], sizes = [8, 32], strides = [1, 1]} : vector<8x128xf32> to vector<8x32xf32>
    %79 = vector.extract_strided_slice %26 {offsets = [0, 32], sizes = [8, 32], strides = [1, 1]} : vector<8x64xf32> to vector<8x32xf32>
    %80 = vector.extract_strided_slice %7 {offsets = [0, 32], sizes = [8, 32], strides = [1, 1]} : vector<8x64xf32> to vector<8x32xf32>
    %81 = tpu.transpose %79, [1, 0] : vector<8x32xf32> -> vector<32x8xf32>
    %cst_35 = arith.constant dense<0.000000e+00> : vector<8x8xf32>
    %82 = tpu.matmul %78, %81, %cst_35 {dimension_numbers = #tpu.dot_dimension_numbers<[1], [0], [0], [1], [0, 0, 1, 1], [], []>} : vector<8x32xf32>, vector<32x8xf32>, vector<8x8xf32> -> vector<8x8xf32>
    %cst_36 = arith.constant 0.176776692 : f32
    %83 = vector.broadcast %cst_36 : f32 to vector<8x8xf32>
    %84 = arith.mulf %82, %83 : vector<8x8xf32>
    %cst_37 = arith.constant -1.000000e+30 : f32
    %85 = vector.broadcast %cst_37 : f32 to vector<8x8xf32>
    %86 = arith.select %29, %84, %85 : vector<8x8xi1>, vector<8x8xf32>
    %cst_38 = arith.constant dense<0xFF800000> : vector<8xf32>
    %87 = vector.multi_reduction <maximumf>, %86, %cst_38 [1] : vector<8x8xf32> to vector<8xf32>
    %88 = vector.shape_cast %87 : vector<8xf32> to vector<8x1xf32>
    %89 = vector.broadcast %88 : vector<8x1xf32> to vector<8x8xf32>
    %90 = arith.subf %86, %89 : vector<8x8xf32>
    %91 = math.exp %90 : vector<8x8xf32>
    %cst_39 = arith.constant dense<0.000000e+00> : vector<8xf32>
    %92 = vector.multi_reduction <add>, %91, %cst_39 [1] : vector<8x8xf32> to vector<8xf32>
    %93 = vector.shape_cast %92 : vector<8xf32> to vector<8x1xf32>
    %cst_40 = arith.constant dense<0.000000e+00> : vector<8x32xf32>
    %94 = tpu.matmul %91, %80, %cst_40 {dimension_numbers = #tpu.dot_dimension_numbers<[1], [0], [0], [1], [0, 0, 1, 1], [], []>} : vector<8x8xf32>, vector<8x32xf32>, vector<8x32xf32> -> vector<8x32xf32>
    %95 = tpu.reciprocal %93 {approx = true} : vector<8x1xf32> -> vector<8x1xf32>
    %96 = vector.broadcast %95 : vector<8x1xf32> to vector<8x32xf32>
    %97 = arith.mulf %94, %96 : vector<8x32xf32>
    %98 = vector.extract_strided_slice %30 {offsets = [64, 0], sizes = [32, 128], strides = [1, 1]} : vector<128x128xf32> to vector<32x128xf32>
    %cst_41 = arith.constant dense<0.000000e+00> : vector<8x128xf32>
    %99 = tpu.matmul %97, %98, %cst_41 {dimension_numbers = #tpu.dot_dimension_numbers<[1], [0], [0], [1], [0, 0, 1, 1], [], []>} : vector<8x32xf32>, vector<32x128xf32>, vector<8x128xf32> -> vector<8x128xf32>
    %100 = arith.addf %77, %99 : vector<8x128xf32>
    %101 = vector.extract_strided_slice %25 {offsets = [0, 96], sizes = [8, 32], strides = [1, 1]} : vector<8x128xf32> to vector<8x32xf32>
    %102 = vector.extract_strided_slice %26 {offsets = [0, 32], sizes = [8, 32], strides = [1, 1]} : vector<8x64xf32> to vector<8x32xf32>
    %103 = vector.extract_strided_slice %7 {offsets = [0, 32], sizes = [8, 32], strides = [1, 1]} : vector<8x64xf32> to vector<8x32xf32>
    %104 = tpu.transpose %102, [1, 0] : vector<8x32xf32> -> vector<32x8xf32>
    %cst_42 = arith.constant dense<0.000000e+00> : vector<8x8xf32>
    %105 = tpu.matmul %101, %104, %cst_42 {dimension_numbers = #tpu.dot_dimension_numbers<[1], [0], [0], [1], [0, 0, 1, 1], [], []>} : vector<8x32xf32>, vector<32x8xf32>, vector<8x8xf32> -> vector<8x8xf32>
    %cst_43 = arith.constant 0.176776692 : f32
    %106 = vector.broadcast %cst_43 : f32 to vector<8x8xf32>
    %107 = arith.mulf %105, %106 : vector<8x8xf32>
    %cst_44 = arith.constant -1.000000e+30 : f32
    %108 = vector.broadcast %cst_44 : f32 to vector<8x8xf32>
    %109 = arith.select %29, %107, %108 : vector<8x8xi1>, vector<8x8xf32>
    %cst_45 = arith.constant dense<0xFF800000> : vector<8xf32>
    %110 = vector.multi_reduction <maximumf>, %109, %cst_45 [1] : vector<8x8xf32> to vector<8xf32>
    %111 = vector.shape_cast %110 : vector<8xf32> to vector<8x1xf32>
    %112 = vector.broadcast %111 : vector<8x1xf32> to vector<8x8xf32>
    %113 = arith.subf %109, %112 : vector<8x8xf32>
    %114 = math.exp %113 : vector<8x8xf32>
    %cst_46 = arith.constant dense<0.000000e+00> : vector<8xf32>
    %115 = vector.multi_reduction <add>, %114, %cst_46 [1] : vector<8x8xf32> to vector<8xf32>
    %116 = vector.shape_cast %115 : vector<8xf32> to vector<8x1xf32>
    %cst_47 = arith.constant dense<0.000000e+00> : vector<8x32xf32>
    %117 = tpu.matmul %114, %103, %cst_47 {dimension_numbers = #tpu.dot_dimension_numbers<[1], [0], [0], [1], [0, 0, 1, 1], [], []>} : vector<8x8xf32>, vector<8x32xf32>, vector<8x32xf32> -> vector<8x32xf32>
    %118 = tpu.reciprocal %116 {approx = true} : vector<8x1xf32> -> vector<8x1xf32>
    %119 = vector.broadcast %118 : vector<8x1xf32> to vector<8x32xf32>
    %120 = arith.mulf %117, %119 : vector<8x32xf32>
    %121 = vector.extract_strided_slice %30 {offsets = [96, 0], sizes = [32, 128], strides = [1, 1]} : vector<128x128xf32> to vector<32x128xf32>
    %cst_48 = arith.constant dense<0.000000e+00> : vector<8x128xf32>
    %122 = tpu.matmul %120, %121, %cst_48 {dimension_numbers = #tpu.dot_dimension_numbers<[1], [0], [0], [1], [0, 0, 1, 1], [], []>} : vector<8x32xf32>, vector<32x128xf32>, vector<8x128xf32> -> vector<8x128xf32>
    %123 = arith.addf %100, %122 : vector<8x128xf32>
    %c0_49 = arith.constant 0 : index
    %c0_50 = arith.constant 0 : index
    %124 = vector.load %arg9[%c0_49, %c0_50] : memref<8x128xf32, #tpu.memory_space<vmem>>, vector<8x128xf32>
    tpu.vector_store %arg9[%c0_49, %c0_50], %123 {strides = array<i32>} : memref<8x128xf32, #tpu.memory_space<vmem>>, vector<8x128xf32>,
    return
  }
}

</mosaic_0001>

<bundles_post_ra>
// kernel: tile.38
= control target key start
LH: loop header
LB: loop body
LE: loop exit
PB: predicated region body
PF: predicated region fallthrough
CT: control target
= control target key end

     0   :  { %s22_s0 = inlined_call_operand.vmem [shape: f32[32], index: 0, kind: input, shape index: {}]   ;;  %s23_s1 = inlined_call_operand.vmem [shape: f32[2,32], index: 1, kind: output, shape index: {}]  }
   0x1   :  { %v4_v0 = vld [vmem:[%s22_s0] ss:$0 sm:$0xff] }
   0x2   :  { %5 = vst [vmem:[%s23_s1] sm:$0x3] %v4_v0 }

// kernel: tile.39
= control target key start
LH: loop header
LB: loop body
LE: loop exit
PB: predicated region body
PF: predicated region fallthrough
CT: control target
= control target key end

     0   :  { %vm7_vm0 = vcmask 261120   ;;  %vm13_vm1 = vcmask 523520   ;;  %s39_s0 = inlined_call_operand.vmem [shape: f32[2,32], index: 0, kind: input, shape index: {}]   ;;  %s40_s1 = inlined_call_operand.vmem [shape: f32[64], index: 1, kind: output, shape index: {}]  }
   0x1   :  { %v4_v0 = vld [vmem:[%s39_s0] sm:$0x3]  ;;  %s22_s0 = smov 32  }
   0x2   :  { %5 = vst [vmem:[#allocation1] sm:$0x3] %v4_v0 }
   0x9   :  { %v10_v1 = vld [vmem:[#allocation1 + $0x1] sm:$0x1]   ;;  %v6_v2 = vld [vmem:[#allocation1] sm:$0x1]  }
   0xa   :  { %11 = vrot.lane.b32.xlu0 %v10_v1, %s22_s0  ;;  %8 = vst.msk [vmem:[#allocation0] sm:$0x1] %vm7_vm0, %v6_v2  }
  0x7c   :  { %v12_v3 = vpop.permute.xlu0 %11  }
  0x7d   :  { %14 = vst.msk [vmem:[#allocation0] sm:$0x1] %vm13_vm1, %v12_v3  }
  0x84   :  { %v18_v4 = vld [vmem:[#allocation0] sm:$0x1] }
  0x85   :  { %20 = vst [vmem:[%s40_s1] sm:$0x1] %v18_v4 }

// kernel: tile.33
= control target key start
LH: loop header
LB: loop body
LE: loop exit
PB: predicated region body
PF: predicated region fallthrough
CT: control target
= control target key end

     0   :  { %s22_s0 = inlined_call_operand.vmem [shape: f32[32], index: 0, kind: input, shape index: {}]   ;;  %s23_s1 = inlined_call_operand.vmem [shape: f32[4,32], index: 1, kind: output, shape index: {}]  }
   0x1   :  { %v4_v0 = vld [vmem:[%s22_s0] ss:$0 sm:$0xff] }
   0x2   :  { %5 = vst [vmem:[%s23_s1] sm:$0xf] %v4_v0 }

// kernel: tile.34
= control target key start
LH: loop header
LB: loop body
LE: loop exit
PB: predicated region body
PF: predicated region fallthrough
CT: control target
= control target key end

     0   :  { %vm7_vm0 = vcmask 261120   ;;  %s37_s8 = smov 32   ;;  %s38_s9 = smov 64   ;;  %vm13_vm1 = vcmask 1048320   ;;  %vm19_vm2 = vcmask 785920   ;;  %vm25_vm3 = vcmask 523520   ;;  %s55_s0 = inlined_call_operand.vmem [shape: f32[4,32], index: 0, kind: input, shape index: {}]   ;;  %s56_s1 = inlined_call_operand.vmem [shape: f32[128], index: 1, kind: output, shape index: {}]  }
   0x1   :  { %v4_v0 = vld [vmem:[%s55_s0] sm:$0xf]  ;;  %s36_s0 = smov 96  }
   0x2   :  { %5 = vst [vmem:[#allocation1] sm:$0xf] %v4_v0 }
   0x9   :  { %v10_v1 = vld [vmem:[#allocation1 + $0x3] sm:$0x1]   ;;  %v22_v2 = vld [vmem:[#allocation1 + $0x1] sm:$0x1]   ;;  %v6_v3 = vld [vmem:[#allocation1] sm:$0x1]  }
   0xa   :  { %11 = vrot.lane.b32.xlu0 %v10_v1, %s36_s0  ;;  %23 = vrot.lane.b32.xlu1 %v22_v2, %s37_s8  ;;  %v16_v4 = vld [vmem:[#allocation1 + $0x2] sm:$0x1]   ;;  %8 = vst.msk [vmem:[#allocation0] sm:$0x1] %vm7_vm0, %v6_v3  }
   0xe   :  { %17 = vrot.lane.b32.xlu0 %v16_v4, %s38_s9 }
  0x7c   :  { %v12_v5 = vpop.permute.xlu0 %11   ;;  %v24_v6 = vpop.permute.xlu1 %23  }
  0x7d   :  { %14 = vst.msk [vmem:[#allocation0] sm:$0x1] %vm13_vm1, %v12_v5  }
  0x80   :  { %v18_v7 = vpop.permute.xlu0 %17  }
  0x81   :  { %20 = vst.msk [vmem:[#allocation0] sm:$0x1] %vm19_vm2, %v18_v7  }
  0x82   :  { %26 = vst.msk [vmem:[#allocation0] sm:$0x1] %vm25_vm3, %v24_v6  }
  0x89   :  { %v30_v8 = vld [vmem:[#allocation0] sm:$0x1] }
  0x8a   :  { %32 = vst [vmem:[%s56_s1] sm:$0x1] %v30_v8 }

// kernel: tile.24
= control target key start
LH: loop header
LB: loop body
LE: loop exit
PB: predicated region body
PF: predicated region fallthrough
CT: control target
= control target key end

     0   :  { %vm26_vm0 = vcmask 1047556   ;;  %vm3_vm1 = vcmask 261120   ;;  %s83_s14 = smov 96   ;;  %s84_s19 = smov 32   ;;  %vm30_vm2 = vcmask 1048320   ;;  %vm40_vm3 = vcmask 785920   ;;  %s174_s0 = inlined_call_operand.vmem [shape: f32[8,6,32], index: 0, kind: input, shape index: {}]   ;;  %s175_s1 = inlined_call_operand.vmem [shape: f32[8,192], index: 1, kind: output, shape index: {}]  }
   0x1   :  { %v71_v0 = vld [vmem:[%s174_s0 + $0x3] ss:$8 sm:$0xf]   ;;  %v75_v3 = vld [vmem:[%s174_s0 + $0x1] ss:$8 sm:$0xf]  }
   0x2   :  { %v72_v1 = vld [vmem:[%s174_s0 + $0x3] ss:$8 sm:$0xf0]   ;;  %v76_v4 = vld [vmem:[%s174_s0 + $0x1] ss:$8 sm:$0xf0]  }
   0x3   :  { %v27_v2 = vsel %vm26_vm0, %v72_v1, %v71_v0  ;;  %v47_v5 = vsel %vm26_vm0, %v76_v4, %v75_v3  ;;  %v73_v6 = vld [vmem:[%s174_s0 + $0x2] ss:$8 sm:$0xf]   ;;  %v77_v9 = vld [vmem:[%s174_s0 + $0x5] ss:$8 sm:$0xf]  }
   0x4   :  { %28 = vrot.lane.b32.xlu0 %v27_v2, %s83_s14  ;;  %v74_v7 = vld [vmem:[%s174_s0 + $0x2] ss:$8 sm:$0xf0]   ;;  %48 = vrot.lane.b32.xlu1 %v47_v5, %s84_s19  ;;  %v78_v10 = vld [vmem:[%s174_s0 + $0x5] ss:$8 sm:$0xf0]  }
   0x5   :  { %v37_v8 = vsel %vm26_vm0, %v74_v7, %v73_v6  ;;  %v2_v11 = vld [vmem:[%s174_s0] ss:$4 sm:$0xff]   ;;  %v57_v12 = vsel %vm26_vm0, %v78_v10, %v77_v9  ;;  %vm50_vm4 = vcmask 523520  }
   0x6   :  { %4 = vst.msk [vmem:[%s175_s1] ss:$8 sm:$0x3] %vm3_vm1, %v2_v11   ;;  %63 = vst.msk [vmem:[%s175_s1 - $0xf] ss:$8 sm:$0xc] %vm3_vm1, %v2_v11  }
   0x7   :  { %64 = vst.msk [vmem:[%s175_s1 - $0x1e] ss:$8 sm:$0x30] %vm3_vm1, %v2_v11   ;;  %65 = vst.msk [vmem:[%s175_s1 - $0x2d] ss:$8 sm:$0xc0] %vm3_vm1, %v2_v11  }
   0x8   :  { %v66_v13 = vld [vmem:[%s174_s0 + $0x20] ss:$4 sm:$0xff]   ;;  %s85_s0 = smov 64   ;;  %58 = vrot.lane.b32.xlu1 %v57_v12, %s84_s19 }
   0x9   :  { %38 = vrot.lane.b32.xlu0 %v37_v8, %s85_s0  ;;  %67 = vst.msk [vmem:[%s175_s1 + $0x4] ss:$8 sm:$0x3] %vm3_vm1, %v66_v13   ;;  %68 = vst.msk [vmem:[%s175_s1 - $0xb] ss:$8 sm:$0xc] %vm3_vm1, %v66_v13  }
   0xa   :  { %69 = vst.msk [vmem:[%s175_s1 - $0x1a] ss:$8 sm:$0x30] %vm3_vm1, %v66_v13   ;;  %70 = vst.msk [vmem:[%s175_s1 - $0x29] ss:$8 sm:$0xc0] %vm3_vm1, %v66_v13  }
  0x76   :  { %v29_v14 = vpop.permute.xlu0 %28   ;;  %v49_v15 = vpop.permute.xlu1 %48  }
  0x77   :  { %31 = vst.msk [vmem:[%s175_s1] sm:$0xff] %vm30_vm2, %v29_v14  }
  0x7a   :  { %v59_v17 = vpop.permute.xlu1 %58  }
  0x7b   :  { %v39_v16 = vpop.permute.xlu0 %38   ;;  %79 = vst.msk [vmem:[%s175_s1 + $0x8] sm:$0xff] %vm50_vm4, %v59_v17  }
  0x7c   :  { %41 = vst.msk [vmem:[%s175_s1] sm:$0xff] %vm40_vm3, %v39_v16  }
  0x7d   :  { %51 = vst.msk [vmem:[%s175_s1] sm:$0xff] %vm50_vm4, %v49_v15  }

// kernel: glm4_moe_attention.1
= control target key start
LH: loop header
LB: loop body
LE: loop exit
PB: predicated region body
PF: predicated region fallthrough
CT: control target
= control target key end

     0   :  { %v1756_v7 = vmov 0.0   ;;  %s2380_s0 = inlined_call_operand.vmem [shape: f32[8,128], index: 0, kind: input, shape index: {}]   ;;  %s2381_s1 = inlined_call_operand.vmem [shape: f32[128,256], index: 1, kind: input, shape index: {}]   ;;  %s2382_s2 = inlined_call_operand.vmem [shape: f32[1,256], index: 2, kind: input, shape index: {}]   ;;  %s2383_s3 = inlined_call_operand.vmem [shape: f32[1,192], index: 3, kind: input, shape index: {}]   ;;  %s2384_s4 = inlined_call_operand.vmem [shape: f32[192,192], index: 4, kind: input, shape index: {}]   ;;  %s2385_s5 = inlined_call_operand.vmem [shape: f32[192,192], index: 5, kind: input, shape index: {}]   ;;  %s2386_s6 = inlined_call_operand.vmem [shape: f32[8,192], index: 6, kind: input, shape index: {}]   ;;  %s2387_s7 = inlined_call_operand.vmem [shape: f32[8,192], index: 7, kind: input, shape index: {}]   ;;  %s2388_s8 = inlined_call_operand.vmem [shape: f32[128,128], index: 8, kind: input, shape index: {}]   ;;  %s2389_s9 = inlined_call_operand.hbm [shape: f32[8,128], index: 9, kind: output, shape index: {}]  }
   0x1   :  { %v35_v0 = vld [vmem:[%s2381_s1 + $0x8] sm:$0xff]  ;;  %v37_v1 = vld [vmem:[%s2381_s1 + $0x18] sm:$0xff]  ;;  %v34_v2 = vld [vmem:[%s2381_s1] sm:$0xff]  ;;  %142 = vmatprep.mubr.f32.mxu0 %v1756_v7 }
   0x2   :  { %v1547_v3 = vpack.c.bf16 %v37_v1, %v35_v0  ;;  %v36_v4 = vld [vmem:[%s2381_s1 + $0x10] sm:$0xff]  ;;  %v39_v5 = vld [vmem:[%s2381_s1 + $0x28] sm:$0xff]  ;;  %v41_v6 = vld [vmem:[%s2381_s1 + $0x38] sm:$0xff] }
   0x3   :  { %v1549_v8 = vpack.c.bf16 %v36_v4, %v34_v2  ;;  %v1551_v9 = vpack.c.bf16 %v41_v6, %v39_v5  ;;  %v38_v10 = vld [vmem:[%s2381_s1 + $0x20] sm:$0xff]  ;;  %v40_v11 = vld [vmem:[%s2381_s1 + $0x30] sm:$0xff]  ;;  %v43_v12 = vld [vmem:[%s2381_s1 + $0x48] sm:$0xff] }
   0x4   :  { %1548 = vmatprep.subr.bf16.mxu0 %v1547_v3  ;;  %v45_v13 = vld [vmem:[%s2381_s1 + $0x58] sm:$0xff]  ;;  %v1553_v14 = vpack.c.bf16 %v40_v11, %v38_v10  ;;  %v42_v16 = vld [vmem:[%s2381_s1 + $0x40] sm:$0xff]  ;;  %v44_v17 = vld [vmem:[%s2381_s1 + $0x50] sm:$0xff] }
   0x5   :  { %1550 = vmatpush1.bf16.msra.mxu0 %v1549_v8  ;;  %v1555_v15 = vpack.c.bf16 %v45_v13, %v43_v12  ;;  %v47_v18 = vld [vmem:[%s2381_s1 + $0x68] sm:$0xff]  ;;  %v49_v19 = vld [vmem:[%s2381_s1 + $0x78] sm:$0xff]  ;;  %v1557_v20 = vpack.c.bf16 %v44_v17, %v42_v16  ;;  %v46_v22 = vld [vmem:[%s2381_s1 + $0x60] sm:$0xff] }
   0x6   :  { %1552 = vmatprep.subr.bf16.mxu0 %v1551_v9  ;;  %v1559_v21 = vpack.c.bf16 %v49_v19, %v47_v18  ;;  %v48_v23 = vld [vmem:[%s2381_s1 + $0x70] sm:$0xff]  ;;  %v51_v24 = vld [vmem:[%s2381_s1 + $0x88] sm:$0xff]  ;;  %v53_v25 = vld [vmem:[%s2381_s1 + $0x98] sm:$0xff] }
   0x7   :  { %v50_v26 = vld [vmem:[%s2381_s1 + $0x80] sm:$0xff]  ;;  %v52_v27 = vld [vmem:[%s2381_s1 + $0x90] sm:$0xff]  ;;  %v152_v28 = vld [vmem:[%s2384_s4 + $0x8] sm:$0xff]  ;;  %v1561_v31 = vpack.c.bf16 %v48_v23, %v46_v22  ;;  %v1563_v36 = vpack.c.bf16 %v53_v25, %v51_v24 }
   0x8   :  { %v154_v29 = vld [vmem:[%s2384_s4 + $0x18] sm:$0xff]  ;;  %v151_v30 = vld [vmem:[%s2384_s4] sm:$0xff]  ;;  %v153_v33 = vld [vmem:[%s2384_s4 + $0x10] sm:$0xff]  ;;  %v1565_v46 = vpack.c.bf16 %v52_v27, %v50_v26 }
   0x9   :  { %1554 = vmatpush1.bf16.msra.mxu0 %v1553_v14  ;;  %v1579_v32 = vpack.c.bf16 %v154_v29, %v152_v28  ;;  %v156_v34 = vld [vmem:[%s2384_s4 + $0x28] sm:$0xff]  ;;  %v158_v35 = vld [vmem:[%s2384_s4 + $0x38] sm:$0xff]  ;;  %v1581_v37 = vpack.c.bf16 %v153_v33, %v151_v30  ;;  %v155_v39 = vld [vmem:[%s2384_s4 + $0x20] sm:$0xff] }
   0xa   :  { %1556 = vmatprep.subr.bf16.mxu0 %v1555_v15  ;;  %v1583_v38 = vpack.c.bf16 %v158_v35, %v156_v34  ;;  %v157_v40 = vld [vmem:[%s2384_s4 + $0x30] sm:$0xff]  ;;  %v160_v41 = vld [vmem:[%s2384_s4 + $0x48] sm:$0xff]  ;;  %v57_v43 = vld [vmem:[%s2381_s1 + $0xb8] sm:$0xff] }
   0xb   :  { %v55_v42 = vld [vmem:[%s2381_s1 + $0xa8] sm:$0xff]  ;;  %1580 = vmatprep.subr.bf16.mxu1 %v1579_v32  ;;  %v162_v44 = vld [vmem:[%s2384_s4 + $0x58] sm:$0xff]  ;;  %v1585_v45 = vpack.c.bf16 %v157_v40, %v155_v39  ;;  %v54_v47 = vld [vmem:[%s2381_s1 + $0xa0] sm:$0xff] }
   0xc   :  { %1582 = vmatpush1.bf16.msra.mxu1 %v1581_v37  ;;  %v1587_v48 = vpack.c.bf16 %v162_v44, %v160_v41  ;;  %v159_v49 = vld [vmem:[%s2384_s4 + $0x40] sm:$0xff]  ;;  %v161_v50 = vld [vmem:[%s2384_s4 + $0x50] sm:$0xff]  ;;  %v1567_v51 = vpack.c.bf16 %v57_v43, %v55_v42  ;;  %v164_v53 = vld [vmem:[%s2384_s4 + $0x68] sm:$0xff] }
   0xd   :  { %1558 = vmatpush1.bf16.msra.mxu0 %v1557_v20  ;;  %1584 = vmatprep.subr.bf16.mxu1 %v1583_v38  ;;  %v56_v52 = vld [vmem:[%s2381_s1 + $0xb0] sm:$0xff]  ;;  %v166_v54 = vld [vmem:[%s2384_s4 + $0x78] sm:$0xff]  ;;  %v59_v55 = vld [vmem:[%s2381_s1 + $0xc8] sm:$0xff]  ;;  %v1589_v57 = vpack.c.bf16 %v161_v50, %v159_v49 }
   0xe   :  { %1560 = vmatprep.subr.bf16.mxu0 %v1559_v21  ;;  %v61_v56 = vld [vmem:[%s2381_s1 + $0xd8] sm:$0xff]  ;;  %v1569_v58 = vpack.c.bf16 %v56_v52, %v54_v47  ;;  %v58_v59 = vld [vmem:[%s2381_s1 + $0xc0] sm:$0xff]  ;;  %v1591_v60 = vpack.c.bf16 %v166_v54, %v164_v53  ;;  %v165_v62 = vld [vmem:[%s2384_s4 + $0x70] sm:$0xff] }
   0xf   :  { %v163_v61 = vld [vmem:[%s2384_s4 + $0x60] sm:$0xff]  ;;  %v1571_v63 = vpack.c.bf16 %v61_v56, %v59_v55  ;;  %v60_v0 = vld [vmem:[%s2381_s1 + $0xd0] sm:$0xff]  ;;  %v168_v1 = vld [vmem:[%s2384_s4 + $0x88] sm:$0xff] }
  0x10   :  { %1586 = vmatpush1.bf16.msra.mxu1 %v1585_v45  ;;  %v170_v2 = vld [vmem:[%s2384_s4 + $0x98] sm:$0xff]  ;;  %v63_v3 = vld [vmem:[%s2381_s1 + $0xe8] sm:$0xff]  ;;  %v62_v5 = vld [vmem:[%s2381_s1 + $0xe0] sm:$0xff]  ;;  %v1593_v6 = vpack.c.bf16 %v165_v62, %v163_v61  ;;  %v1573_v8 = vpack.c.bf16 %v60_v0, %v58_v59 }
  0x11   :  { %1562 = vmatpush1.bf16.msra.mxu0 %v1561_v31  ;;  %1588 = vmatprep.subr.bf16.mxu1 %v1587_v48  ;;  %v65_v4 = vld [vmem:[%s2381_s1 + $0xf8] sm:$0xff]  ;;  %v64_v9 = vld [vmem:[%s2381_s1 + $0xf0] sm:$0xff]  ;;  %v1595_v10 = vpack.c.bf16 %v170_v2, %v168_v1  ;;  %v167_v11 = vld [vmem:[%s2384_s4 + $0x80] sm:$0xff] }
  0x12   :  { %1564 = vmatprep.subr.bf16.mxu0 %v1563_v36  ;;  %v169_v12 = vld [vmem:[%s2384_s4 + $0x90] sm:$0xff]  ;;  %v1575_v13 = vpack.c.bf16 %v65_v4, %v63_v3  ;;  %v172_v14 = vld [vmem:[%s2384_s4 + $0xa8] sm:$0xff]  ;;  %v174_v15 = vld [vmem:[%s2384_s4 + $0xb8] sm:$0xff] }
  0x14   :  { %1590 = vmatpush1.bf16.msra.mxu1 %v1589_v57 }
  0x15   :  { %1566 = vmatpush1.bf16.msra.mxu0 %v1565_v46  ;;  %1592 = vmatprep.subr.bf16.mxu1 %v1591_v60 }
  0x16   :  { %1568 = vmatprep.subr.bf16.mxu0 %v1567_v51 }
  0x19   :  { %1570 = vmatpush1.bf16.msra.mxu0 %v1569_v58 }
  0x1a   :  { %1572 = vmatprep.subr.bf16.mxu0 %v1571_v63 }
  0x1b   :  { %14 = vsyncpa [#allocation3], 0  ;;  %1594 = vmatpush1.bf16.msra.mxu1 %v1593_v6  ;;  %v1597_v16 = vpack.c.bf16 %v169_v12, %v167_v11  ;;  %v1577_v17 = vpack.c.bf16 %v64_v9, %v62_v5  ;;  %v1599_v18 = vpack.c.bf16 %v174_v15, %v172_v14  ;;  %v171_v19 = vld [vmem:[%s2384_s4 + $0xa0] sm:$0xff]  ;;  %v173_v20 = vld [vmem:[%s2384_s4 + $0xb0] sm:$0xff]  ;;  %vm199_vm0 = vcmask 523264   ;;  %s1758_s26 = smov 96  }
  0x1c   :  { %1596 = vmatprep.subr.bf16.mxu1 %v1595_v10  ;;  %v176_v21 = vld [vmem:[%s2384_s4 + $0xc8] sm:$0xff]  ;;  %v178_v22 = vld [vmem:[%s2384_s4 + $0xd8] sm:$0xff]  ;;  %v1601_v23 = vpack.c.bf16 %v173_v20, %v171_v19  ;;  %v33_v24 = vld [vmem:[%s2380_s0] sm:$0xff]  ;;  %vm1757_vm1 = vmmov 0   ;;  %vm445_vm2 = vcmask 261120   ;;  %vm524_vm4 = vcmask 64512  }
  0x1d   :  { %1574 = vmatpush1.bf16.msra.mxu0 %v1573_v8  ;;  %v1603_v25 = vpack.c.bf16 %v178_v22, %v176_v21  ;;  %v175_v26 = vld [vmem:[%s2384_s4 + $0xc0] sm:$0xff]  ;;  %v177_v27 = vld [vmem:[%s2384_s4 + $0xd0] sm:$0xff]  ;;  %v180_v28 = vld [vmem:[%s2384_s4 + $0xe8] sm:$0xff]  ;;  %s1762_s0 = smov [#allocation2]  }
  0x1e   :  { %1576 = vmatprep.subr.bf16.mxu0 %v1575_v13  ;;  %v182_v29 = vld [vmem:[%s2384_s4 + $0xf8] sm:$0xff]  ;;  %v1605_v30 = vpack.c.bf16 %v177_v27, %v175_v26  ;;  %v179_v32 = vld [vmem:[%s2384_s4 + $0xe0] sm:$0xff]  ;;  %v181_v33 = vld [vmem:[%s2384_s4 + $0xf0] sm:$0xff]  ;;  %s1401_s29 = sshll.u32 %s1762_s0, 4  ;;  %s1402_s29 = int_to_ptr.vmem [resolvable:$true] %s1401_s29 }
  0x1f   :  { %1598 = vmatpush1.bf16.msra.mxu1 %v1597_v16  ;;  %v1607_v31 = vpack.c.bf16 %v182_v29, %v180_v28  ;;  %v184_v34 = vld [vmem:[%s2384_s4 + $0x108] sm:$0xff]  ;;  %v186_v35 = vld [vmem:[%s2384_s4 + $0x118] sm:$0xff]  ;;  %v1609_v36 = vpack.c.bf16 %v181_v33, %v179_v32  ;;  %v183_v38 = vld [vmem:[%s2384_s4 + $0x100] sm:$0xff]  ;;  %p1737_p1 = scmp.lt.s32.totalorder %s1402_s29, %s1402_s29 }
  0x20   :  { %1600 = vmatprep.subr.bf16.mxu1 %v1599_v18  ;;  %v1611_v37 = vpack.c.bf16 %v186_v35, %v184_v34  ;;  %v185_v39 = vld [vmem:[%s2384_s4 + $0x110] sm:$0xff]  ;;  %v188_v40 = vld [vmem:[%s2384_s4 + $0x128] sm:$0xff]  ;;  %v190_v41 = vld [vmem:[%s2384_s4 + $0x138] sm:$0xff] }
  0x21   :  { %1578 = vmatpush1.bf16.msra.mxu0 %v1577_v17  ;;  %v1613_v42 = vpack.c.bf16 %v185_v39, %v183_v38  ;;  %v1615_v43 = vpack.c.bf16 %v190_v41, %v188_v40  ;;  %v187_v44 = vld [vmem:[%s2384_s4 + $0x120] sm:$0xff]  ;;  %v189_v45 = vld [vmem:[%s2384_s4 + $0x130] sm:$0xff]  ;;  %v192_v46 = vld [vmem:[%s2384_s4 + $0x148] sm:$0xff]  ;;  %v68_v38 = vlaneseq }
  0x22   :  { %v194_v47 = vld [vmem:[%s2384_s4 + $0x158] sm:$0xff]  ;;  %v1617_v48 = vpack.c.bf16 %v189_v45, %v187_v44  ;;  %v191_v50 = vld [vmem:[%s2384_s4 + $0x140] sm:$0xff]  ;;  %v193_v51 = vld [vmem:[%s2384_s4 + $0x150] sm:$0xff] }
  0x23   :  { %1602 = vmatpush1.bf16.msra.mxu1 %v1601_v23  ;;  %v1619_v49 = vpack.c.bf16 %v194_v47, %v192_v46  ;;  %v1621_v52 = vpack.c.bf16 %v193_v51, %v191_v50  ;;  %v196_v53 = vld [vmem:[%s2384_s4 + $0x168] sm:$0xff]  ;;  %v198_v54 = vld [vmem:[%s2384_s4 + $0x178] sm:$0xff]  ;;  %v195_v56 = vld [vmem:[%s2384_s4 + $0x160] sm:$0xff]  ;;  %v2143_v39 = vshrl.u32 %v68_v38, 7 }
  0x24   :  { %143 = vmatmul.mubr.f32.vlgmr.msra.gmra.mrb[0].mxu0 %v33_v24  ;;  %1604 = vmatprep.subr.bf16.mxu1 %v1603_v25  ;;  %v1623_v55 = vpack.c.bf16 %v198_v54, %v196_v53  ;;  %v197_v57 = vld [vmem:[%s2384_s4 + $0x170] sm:$0xff]  ;;  %v297_v59 = vld [vmem:[%s2385_s5 + $0x8] sm:$0xff]  ;;  %v299_v60 = vld [vmem:[%s2385_s5 + $0x18] sm:$0xff] }
  0x25   :  { %v1625_v58 = vpack.c.bf16 %v197_v57, %v195_v56  ;;  %v296_v61 = vld [vmem:[%s2385_s5] sm:$0xff]  ;;  %v1627_v62 = vpack.c.bf16 %v299_v60, %v297_v59  ;;  %v298_v63 = vld [vmem:[%s2385_s5 + $0x10] sm:$0xff]  ;;  %v301_v0 = vld [vmem:[%s2385_s5 + $0x28] sm:$0xff]  ;;  %v70_v40 = vsub.s32 0, %v2143_v39 }
  0x26   :  { %v303_v1 = vld [vmem:[%s2385_s5 + $0x38] sm:$0xff]  ;;  %v1629_v2 = vpack.c.bf16 %v298_v63, %v296_v61  ;;  %v300_v4 = vld [vmem:[%s2385_s5 + $0x20] sm:$0xff]  ;;  %v302_v5 = vld [vmem:[%s2385_s5 + $0x30] sm:$0xff] }
  0x27   :  { %1606 = vmatpush1.bf16.msra.mxu1 %v1605_v30  ;;  %v1631_v3 = vpack.c.bf16 %v303_v1, %v301_v0  ;;  %v305_v6 = vld [vmem:[%s2385_s5 + $0x48] sm:$0xff]  ;;  %1628 = vmatprep.subr.bf16.mxu0 %v1627_v62  ;;  %v307_v8 = vld [vmem:[%s2385_s5 + $0x58] sm:$0xff]  ;;  %v1633_v9 = vpack.c.bf16 %v302_v5, %v300_v4  ;;  %v304_v11 = vld [vmem:[%s2385_s5 + $0x40] sm:$0xff] }
  0x28   :  { %1608 = vmatprep.subr.bf16.mxu1 %v1607_v31  ;;  %1630 = vmatpush1.bf16.msra.mxu0 %v1629_v2  ;;  %v1635_v10 = vpack.c.bf16 %v307_v8, %v305_v6  ;;  %v306_v12 = vld [vmem:[%s2385_s5 + $0x50] sm:$0xff]  ;;  %v309_v13 = vld [vmem:[%s2385_s5 + $0x68] sm:$0xff]  ;;  %v311_v14 = vld [vmem:[%s2385_s5 + $0x78] sm:$0xff] }
  0x29   :  { %1632 = vmatprep.subr.bf16.mxu0 %v1631_v3  ;;  %v1637_v15 = vpack.c.bf16 %v306_v12, %v304_v11  ;;  %v1639_v16 = vpack.c.bf16 %v311_v14, %v309_v13  ;;  %v308_v17 = vld [vmem:[%s2385_s5 + $0x60] sm:$0xff]  ;;  %v310_v18 = vld [vmem:[%s2385_s5 + $0x70] sm:$0xff]  ;;  %v313_v19 = vld [vmem:[%s2385_s5 + $0x88] sm:$0xff] }
  0x2a   :  { %v315_v20 = vld [vmem:[%s2385_s5 + $0x98] sm:$0xff]  ;;  %v1641_v21 = vpack.c.bf16 %v310_v18, %v308_v17  ;;  %v312_v23 = vld [vmem:[%s2385_s5 + $0x80] sm:$0xff]  ;;  %v314_v24 = vld [vmem:[%s2385_s5 + $0x90] sm:$0xff] }
  0x2b   :  { %1610 = vmatpush1.bf16.msra.mxu1 %v1609_v36  ;;  %v1643_v22 = vpack.c.bf16 %v315_v20, %v313_v19  ;;  %v317_v25 = vld [vmem:[%s2385_s5 + $0xa8] sm:$0xff]  ;;  %v319_v26 = vld [vmem:[%s2385_s5 + $0xb8] sm:$0xff]  ;;  %v1645_v27 = vpack.c.bf16 %v314_v24, %v312_v23  ;;  %v316_v29 = vld [vmem:[%s2385_s5 + $0xa0] sm:$0xff] }
  0x2c   :  { %1612 = vmatprep.subr.bf16.mxu1 %v1611_v37  ;;  %1634 = vmatpush1.bf16.msra.mxu0 %v1633_v9  ;;  %v1647_v28 = vpack.c.bf16 %v319_v26, %v317_v25  ;;  %v318_v30 = vld [vmem:[%s2385_s5 + $0xb0] sm:$0xff]  ;;  %v321_v31 = vld [vmem:[%s2385_s5 + $0xc8] sm:$0xff]  ;;  %v323_v32 = vld [vmem:[%s2385_s5 + $0xd8] sm:$0xff] }
  0x2d   :  { %1636 = vmatprep.subr.bf16.mxu0 %v1635_v10  ;;  %v1649_v33 = vpack.c.bf16 %v318_v30, %v316_v29  ;;  %v1651_v34 = vpack.c.bf16 %v323_v32, %v321_v31  ;;  %v320_v35 = vld [vmem:[%s2385_s5 + $0xc0] sm:$0xff]  ;;  %v322_v36 = vld [vmem:[%s2385_s5 + $0xd0] sm:$0xff]  ;;  %v325_v51 = vld [vmem:[%s2385_s5 + $0xe8] sm:$0xff] }
  0x2e   :  { %v1653_v37 = vpack.c.bf16 %v322_v36, %v320_v35  ;;  %v66_v41 = vld [vmem:[%s2382_s2] sm:$0x3]  ;;  %v329_v57 = vld [vmem:[%s2385_s5 + $0x108] sm:$0xff]  ;;  %v330_v61 = vld [vmem:[%s2385_s5 + $0x110] sm:$0xff] }
  0x2f   :  { %1614 = vmatpush1.bf16.msra.mxu1 %v1613_v42  ;;  %v74_v42 = vsub.s32 1, %v2143_v39  ;;  %v324_v54 = vld [vmem:[%s2385_s5 + $0xe0] sm:$0xff]  ;;  %v333_v63 = vld [vmem:[%s2385_s5 + $0x128] sm:$0xff]  ;;  %v335_v0 = vld [vmem:[%s2385_s5 + $0x138] sm:$0xff] }
  0x30   :  { %1616 = vmatprep.subr.bf16.mxu1 %v1615_v43  ;;  %1638 = vmatpush1.bf16.msra.mxu0 %v1637_v15  ;;  %v71_v43 = vrot.slane %v66_v41, %v70_v40  ;;  %v328_v60 = vld [vmem:[%s2385_s5 + $0x100] sm:$0xff]  ;;  %v1663_v2 = vpack.c.bf16 %v335_v0, %v333_v63  ;;  %v334_v3 = vld [vmem:[%s2385_s5 + $0x130] sm:$0xff]  ;;  %v337_v4 = vld [vmem:[%s2385_s5 + $0x148] sm:$0xff] }
  0x31   :  { %1640 = vmatprep.subr.bf16.mxu0 %v1639_v16  ;;  %v75_v44 = vrot.slane %v66_v41, %v74_v42  ;;  %v1661_v62 = vpack.c.bf16 %v330_v61, %v328_v60  ;;  %v332_v1 = vld [vmem:[%s2385_s5 + $0x120] sm:$0xff]  ;;  %v339_v5 = vld [vmem:[%s2385_s5 + $0x158] sm:$0xff]  ;;  %v338_v10 = vld [vmem:[%s2385_s5 + $0x150] sm:$0xff] }
  0x32   :  { %v1665_v6 = vpack.c.bf16 %v334_v3, %v332_v1  ;;  %v1667_v8 = vpack.c.bf16 %v339_v5, %v337_v4  ;;  %v336_v9 = vld [vmem:[%s2385_s5 + $0x140] sm:$0xff]  ;;  %v341_v11 = vld [vmem:[%s2385_s5 + $0x168] sm:$0xff]  ;;  %v343_v12 = vld [vmem:[%s2385_s5 + $0x178] sm:$0xff] }
  0x33   :  { %1618 = vmatpush1.bf16.msra.mxu1 %v1617_v48  ;;  %v1669_v13 = vpack.c.bf16 %v338_v10, %v336_v9  ;;  %v1671_v14 = vpack.c.bf16 %v343_v12, %v341_v11  ;;  %v340_v15 = vld [vmem:[%s2385_s5 + $0x160] sm:$0xff]  ;;  %v342_v16 = vld [vmem:[%s2385_s5 + $0x170] sm:$0xff] }
  0x34   :  { %1620 = vmatprep.subr.bf16.mxu1 %v1619_v49  ;;  %1642 = vmatpush1.bf16.msra.mxu0 %v1641_v21  ;;  %v1673_v17 = vpack.c.bf16 %v342_v16, %v340_v15  ;;  %v292_v31 = vld [vmem:[%s2386_s6] sm:$0xff] }
  0x35   :  { %1644 = vmatprep.subr.bf16.mxu0 %v1643_v22  ;;  %v278_v22 = vld [vmem:[%s2383_s3] sm:$0x3] }
  0x36   :  { %v287_v24 = vrot.slane %v278_v22, %v74_v42  ;;  %v283_v26 = vrot.slane %v278_v22, %v70_v40  ;;  %v418_v32 = vld [vmem:[%s2387_s7] sm:$0xff] }
  0x37   :  { %1622 = vmatpush1.bf16.msra.mxu1 %v1621_v52  ;;  %v327_v52 = vld [vmem:[%s2385_s5 + $0xf8] sm:$0xff] }
  0x38   :  { %1624 = vmatprep.subr.bf16.mxu1 %v1623_v55  ;;  %1646 = vmatpush1.bf16.msra.mxu0 %v1645_v27  ;;  %v1655_v53 = vpack.c.bf16 %v327_v52, %v325_v51  ;;  %v326_v55 = vld [vmem:[%s2385_s5 + $0xf0] sm:$0xff] }
  0x39   :  { %1648 = vmatprep.subr.bf16.mxu0 %v1647_v28  ;;  %v1657_v56 = vpack.c.bf16 %v326_v55, %v324_v54 }
  0x3b   :  { %1626 = vmatpush1.bf16.msra.mxu1 %v1625_v58  ;;  %v331_v58 = vld [vmem:[%s2385_s5 + $0x118] sm:$0xff] }
  0x3c   :  { %1468 = vmatprep.subr.mxu1 %v1756_v7  ;;  %1650 = vmatpush1.bf16.msra.mxu0 %v1649_v33  ;;  %v1659_v59 = vpack.c.bf16 %v331_v58, %v329_v57  ;;  %v293_v33 = vld [vmem:[%s2386_s6 + $0x8] sm:$0xff]  ;;  %s1759_s6 = smov 64  }
  0x3d   :  { %1652 = vmatprep.subr.bf16.mxu0 %v1651_v34  ;;  %v419_v34 = vld [vmem:[%s2387_s7 + $0x8] sm:$0xff]  ;;  %s1760_s7 = smov 32  }
  0x40   :  { %1654 = vmatpush1.bf16.msra.mxu0 %v1653_v37 }
  0x41   :  { %1656 = vmatprep.subr.bf16.mxu0 %v1655_v53 }
  0x44   :  { %1658 = vmatpush1.bf16.msra.mxu0 %v1657_v56 }
  0x45   :  { %1660 = vmatprep.subr.bf16.mxu0 %v1659_v59 }
  0x48   :  { %1662 = vmatpush1.bf16.msra.mxu0 %v1661_v62 }
  0x49   :  { %1664 = vmatprep.subr.bf16.mxu0 %v1663_v2 }
  0x4c   :  { %1666 = vmatpush1.bf16.msra.mxu0 %v1665_v6 }
  0x4d   :  { %1668 = vmatprep.subr.bf16.mxu0 %v1667_v8 }
  0x50   :  { %1670 = vmatpush1.bf16.msra.mxu0 %v1669_v13 }
  0x51   :  { %1672 = vmatprep.subr.bf16.mxu0 %v1671_v14 }
  0x54   :  { %1674 = vmatpush1.bf16.msra.mxu0 %v1673_v17 }
  0x55   :  { %1463 = vmatprep.subr.mxu0 %v1756_v7 }
  0xf7   :  { %v144_v45 = vpop.f32.mrb[0].mxu0 }
  0xf8   :  { %v145_v46 = vadd.f32 %v144_v45, %v71_v43  ;;  %v146_v47 = vpop.f32.mrb[1].mxu0 }
  0xf9   :  { %v2152_v48 = vadd.f32 %v146_v47, %v75_v44 }
  0xfa   :  { %v149_v50 = vmul.f32 %v145_v46, %v145_v46 }
  0xfb   :  { %v150_v49 = vmul.f32 %v2152_v48, %v2152_v48 }
  0xfd   :  { %1409 = vmatprep.mubr.msk.f32.mxu1 %vm199_vm0, %v150_v49 }
  0xfe   :  { %268 = vmatmul.mubr.f32.vlgmr.msra.gmra.mrb[0].mxu1 %v149_v50  ;;  %v2258_v50 = vand.u32 127, %v68_v38 }
  0xff   :  { %1470 = vmatprep.mubr.msk.f32.mxu1 %vm1757_vm1, %v1756_v7 }
 0x100   :  { %vm428_vm3 = vcmp.le.s32.totalorder %v2258_v50, %v2143_v39  ;;  %v435_v39 = vld [vmem:[%s2388_s8 + $0x30] sm:$0xff] }
 0x101   :  { %v431_v50 = vld [vmem:[%s2388_s8 + $0x10] sm:$0xff] }
 0x1d1   :  { %v269_v18 = vpop.f32.mrb[0].mxu1 }
 0x1d2   :  { %v270_v19 = vadd.f32 1e-05, %v269_v18  ;;  %v271_v20 = vpop.f32.mrb[1].mxu1 }
 0x1d3   :  { %v272_v21 = vadd.f32 1e-05, %v271_v20 }
 0x1d4   :  { %1712 = vrsqrt.f32 %v270_v19 }
 0x1d5   :  { %1714 = vrsqrt.f32 %v272_v21 }
 0x1de   :  { %v1713_v23 = vpop.eup %1712 }
 0x1df   :  { %v1715_v25 = vpop.eup %1714  ;;  %v276_v27 = vmul.f32 %v1713_v23, %v145_v46 }
 0x1e0   :  { %v277_v28 = vmul.f32 %v1715_v25, %v2152_v48 }
 0x1e1   :  { %v290_v30 = vmul.f32 %v283_v26, %v276_v27 }
 0x1e2   :  { %v291_v29 = vmul.f32 %v287_v24, %v277_v28  ;;  %v433_v28 = vld [vmem:[%s2388_s8 + $0x20] sm:$0xff] }
 0x1e3   :  { %v294_v36 = vmul.f32 %v292_v31, %v290_v30 }
 0x1e4   :  { %1410 = vmatprep.mubr.msk.f32.mxu0 %vm199_vm0, %v291_v29  ;;  %v295_v41 = vmul.f32 %v293_v33, %v291_v29  ;;  %v434_v29 = vld [vmem:[%s2388_s8 + $0x28] sm:$0xff] }
 0x1e5   :  { %412 = vmatmul.mubr.f32.vlgmr.msra.gmra.mrb[2].mxu0 %v290_v30  ;;  %v1761_v30 = vmov 0.0|0.0   ;;  %v1676_v31 = vpack.c.bf16 %v434_v29, %v433_v28 }
 0x1e6   :  { %1465 = vmatprep.mubr.msk.f32.mxu0 %vm1757_vm1, %v1756_v7 }
 0x2b8   :  { %v413_v35 = vpop.f32.mrb[2].mxu0 }
 0x2b9   :  { %v420_v37 = vmul.f32 %v418_v32, %v413_v35  ;;  %v415_v40 = vpop.f32.mrb[3].mxu0  ;;  %v436_v32 = vld [vmem:[%s2388_s8 + $0x38] sm:$0xff] }
 0x2ba   :  { %v421_v42 = vmul.f32 %v419_v34, %v415_v40  ;;  %v1679_v33 = vpack.c.bf16 %v436_v32, %v435_v39 }
 0x2bb   :  { %v422_v43 = vadd.f32 %v420_v37, %v294_v36 }
 0x2bc   :  { %v423_v44 = vadd.f32 %v421_v42, %v295_v41  ;;  %v429_v42 = vld [vmem:[%s2388_s8] sm:$0xff] }
 0x2bd   :  { %613 = vrot.lane.b32.xlu1 %v422_v43, %s1758_s26 }
 0x2be   :  { %1464 = vmatpush3.xpose.msk.msra.mxu0 %vm445_vm2, %v423_v44 }
 0x2bf   :  { %1505 = vmatprep.subr.mxu0 %v1756_v7 }
 0x2c1   :  { %921 = vrot.lane.b32.xlu1 %v423_v44, %s1758_s26  ;;  %1466 = vmatmul.mubr.msk.f32.vlgmr.msra.gmra.mrb[4].mxu0 %vm445_vm2, %v422_v43 }
 0x2c2   :  { %1507 = vmatprep.mubr.msk.f32.mxu0 %vm1757_vm1, %v1756_v7 }
 0x2c5   :  { %919 = vrot.lane.b32.xlu1 %v422_v43, %s1759_s6 }
 0x2c9   :  { %1160 = vrot.lane.b32.xlu1 %v422_v43, %s1760_s7  ;;  %v430_v43 = vld [vmem:[%s2388_s8 + $0x8] sm:$0xff] }
 0x32f   :  { %v614_v45 = vpop.permute.xlu1 %613 }
 0x333   :  { %v922_v46 = vpop.permute.xlu1 %921 }
 0x334   :  { %1506 = vmatpush3.xpose.msk.msra.mxu0 %vm445_vm2, %v922_v46 }
 0x335   :  { %1526 = vmatprep.subr.mxu0 %v1756_v7 }
 0x337   :  { %v920_v47 = vpop.permute.xlu1 %919 }
 0x338   :  { %1508 = vmatmul.mubr.msk.f32.vlgmr.msra.gmra.mrb[6].mxu0 %vm445_vm2, %v920_v47 }
 0x339   :  { %1527 = vmatpush3.xpose.msk.msra.mxu0 %vm445_vm2, %v922_v46  ;;  %1528 = vmatprep.mubr.msk.f32.mxu0 %vm1757_vm1, %v1756_v7  ;;  %v1682_v46 = vpack.c.bf16 %v430_v43, %v429_v42 }
 0x33a   :  { %1531 = vmatprep.subr.mxu0 %v1756_v7 }
 0x33b   :  { %v1161_v49 = vpop.permute.xlu1 %1160 }
 0x33c   :  { %1529 = vmatmul.mubr.msk.f32.vlgmr.msra.gmra.mrb[8].mxu0 %vm445_vm2, %v1161_v49 }
 0x33d   :  { %1533 = vmatprep.mubr.msk.f32.mxu0 %vm1757_vm1, %v1756_v7 }
 0x394   :  { %v518_v51 = vpop.f32.mrb[4].mxu0 }
 0x395   :  { %v522_v52 = vmul.f32 0.17677669, %v518_v51  ;;  %v1467_v53 = vpop.f32.mrb[5].mxu0  ;;  %v432_v51 = vld [vmem:[%s2388_s8 + $0x18] sm:$0xff] }
 0x396   :  { %v437_v53 = vld [vmem:[%s2388_s8 + $0x40] sm:$0xff] }
 0x397   :  { %v523_v54 = vsel %vm428_vm3, %v522_v52, -1e+30  ;;  %v1685_v52 = vpack.c.bf16 %v432_v51, %v431_v50 }
 0x398   :  { %v525_v55 = vsel %vm524_vm4, %v523_v54, -inf }
 0x399   :  { %526 = vmax.xlane.f32.xlu0 %v525_v55 }
 0x3af   :  { %535 = vrot.lane.b32.xlu0 %v2152_v48, %s1759_s6 }
 0x40b   :  { %v993_v56 = vpop.f32.mrb[6].mxu0 }
 0x40c   :  { %v1509_v57 = vpop.f32.mrb[7].mxu0  ;;  %v997_v8 = vmul.f32 0.17677669, %v993_v56  ;;  %v439_v56 = vld [vmem:[%s2388_s8 + $0x50] sm:$0xff] }
 0x40d   :  { %v440_v57 = vld [vmem:[%s2388_s8 + $0x58] sm:$0xff] }
 0x40e   :  { %v998_v10 = vsel %vm428_vm3, %v997_v8, -1e+30 }
 0x40f   :  { %v1230_v38 = vpop.f32.mrb[8].mxu0  ;;  %v999_v11 = vsel %vm524_vm4, %v998_v10, -inf }
 0x410   :  { %v1530_v58 = vpop.f32.mrb[9].mxu0  ;;  %v1234_v20 = vmul.f32 0.17677669, %v1230_v38  ;;  %v1691_v38 = vpack.c.bf16 %v440_v57, %v439_v56 }
 0x412   :  { %v1235_v24 = vsel %vm428_vm3, %v1234_v20, -1e+30 }
 0x413   :  { %v1236_v25 = vsel %vm524_vm4, %v1235_v24, -inf }
 0x426   :  { %v527_v59 = vpop.xlane.xlu0 %526 }
 0x427   :  { %v528_v60 = vsub.f32 %v523_v54, %v527_v59  ;;  %v438_v54 = vld [vmem:[%s2388_s8 + $0x48] sm:$0xff] }
 0x428   :  { %v1688_v55 = vpack.c.bf16 %v438_v54, %v437_v53 }
 0x429   :  { %v529_v61 = vmul.f32 1.442695, %v528_v60 }
 0x42a   :  { %v536_v62 = vpop.permute.xlu0 %535 }
 0x42b   :  { %1716 = vpow2.f32 %v529_v61  ;;  %1469 = vmatpush3.msra.mxu1 %v536_v62 }
 0x42c   :  { %1473 = vmatprep.subr.mxu1 %v1756_v7 }
 0x435   :  { %v1717_v63 = vpop.eup %1716 }
 0x436   :  { %1471 = vmatmul.mubr.msk.f32.vlgmr.msra.gmra.mrb[2].mxu1 %vm524_vm4, %v1717_v63  ;;  %v531_v9 = vsel %vm524_vm4, %v1717_v63, 0.0  ;;  %v442_v63 = vld [vmem:[%s2388_s8 + $0x68] sm:$0xff] }
 0x437   :  { %1474 = vmatpush3.xpose.msk.msra.mxu1 %vm445_vm2, %v423_v44  ;;  %1475 = vmatprep.mubr.msk.f32.mxu1 %vm1757_vm1, %v1756_v7 }
 0x438   :  { %1478 = vmatprep.subr.mxu1 %v1756_v7 }
 0x43a   :  { %1476 = vmatmul.mubr.msk.f32.vlgmr.msra.gmra.mrb[4].mxu1 %vm445_vm2, %v614_v45 }
 0x43b   :  { %1479 = vmatpush3.msra.mxu1 %v536_v62  ;;  %1480 = vmatprep.mubr.msk.f32.mxu1 %vm1757_vm1, %v1756_v7  ;;  %v441_v62 = vld [vmem:[%s2388_s8 + $0x60] sm:$0xff] }
 0x43c   :  { %1675 = vmatprep.subr.bf16.mxu1 %v1761_v30 }
 0x509   :  { %v607_v0 = vpop.f32.mrb[2].mxu1 }
 0x50a   :  { %v1472_v1 = vpop.f32.mrb[3].mxu1 }
 0x50d   :  { %v683_v2 = vpop.f32.mrb[4].mxu1 }
 0x50e   :  { %v687_v3 = vmul.f32 0.17677669, %v683_v2  ;;  %v1477_v4 = vpop.f32.mrb[5].mxu1  ;;  %v1694_v2 = vpack.c.bf16 %v442_v63, %v441_v62 }
 0x510   :  { %v688_v5 = vsel %vm428_vm3, %v687_v3, -1e+30 }
 0x511   :  { %v689_v6 = vsel %vm524_vm4, %v688_v5, -inf }
 0x512   :  { %690 = vmax.xlane.f32.xlu1 %v689_v6  ;;  %v444_v6 = vld [vmem:[%s2388_s8 + $0x78] sm:$0xff] }
 0x516   :  { %532 = vadd.xlane.f32.xlu1 %v531_v9 }
 0x51a   :  { %1000 = vmax.xlane.f32.xlu1 %v999_v11 }
 0x52b   :  { %1008 = vrot.lane.b32.xlu1 %v2152_v48, %s1760_s7 }
 0x59f   :  { %v691_v12 = vpop.xlane.xlu1 %690 }
 0x5a0   :  { %v692_v13 = vsub.f32 %v688_v5, %v691_v12  ;;  %v443_v5 = vld [vmem:[%s2388_s8 + $0x70] sm:$0xff]  ;;  %s1732_s8 = scalar_lea.vmem %s1402_s29, 128 }
 0x5a1   :  { %v1697_v8 = vpack.c.bf16 %v444_v6, %v443_v5  ;;  %p1733_p0 = scmp.ne.s32.totalorder %s1402_s29, %s1732_s8  ;;  %p1738_p2 = scmp.lt.s32.totalorder %s1732_s8, %s1732_s8 }
 0x5a2   :  { %v693_v14 = vmul.f32 1.442695, %v692_v13 }
 0x5a3   :  { %v533_v15 = vpop.xlane.xlu1 %532  ;;  %p1739_p3 = por %p1738_p2, %p1737_p1 }
 0x5a4   :  { %1718 = vpow2.f32 %v693_v14 }
 0x5a5   :  { %1720 = vrcp.f32 %v533_v15  ;;  %p1740_p4 = pnand %p1739_p3, %p1733_p0 }
 0x5a7   :  { %v1001_v16 = vpop.xlane.xlu1 %1000 }
 0x5a8   :  { %v1002_v17 = vsub.f32 %v998_v10, %v1001_v16 }
 0x5aa   :  { %v1003_v18 = vmul.f32 1.442695, %v1002_v17 }
 0x5ab   :  { %v1009_v19 = vpop.permute.xlu1 %1008 }
 0x5ac   :  { %1722 = vpow2.f32 %v1003_v18  ;;  %1532 = vmatpush3.msra.mxu0 %v1009_v19 }
 0x5ae   :  { %v1719_v21 = vpop.eup %1718 }
 0x5af   :  { %v1721_v22 = vpop.eup %1720  ;;  %1481 = vmatmul.mubr.msk.f32.vlgmr.msra.gmra.mrb[6].mxu1 %vm524_vm4, %v1719_v21  ;;  %v695_v23 = vsel %vm524_vm4, %v1719_v21, 0.0 }
 0x5b0   :  { %v612_v48 = vmul.f32 %v1721_v22, %v607_v0  ;;  %696 = vadd.xlane.f32.xlu0 %v695_v23  ;;  %1491 = vmatprep.mubr.msk.f32.mxu1 %vm1757_vm1, %v1756_v7 }
 0x5b1   :  { %1677 = vmatpush3.bf16.msra.mxu1 %v1676_v31 }
 0x5b2   :  { %1678 = vmatprep.subr.bf16.mxu1 %v1761_v30 }
 0x5b4   :  { %1237 = vmax.xlane.f32.xlu0 %v1236_v25 }
 0x5b5   :  { %1680 = vmatpush3.bf16.msra.mxu1 %v1679_v33 }
 0x5b6   :  { %v1723_v26 = vpop.eup %1722  ;;  %1681 = vmatprep.subr.bf16.mxu1 %v1761_v30 }
 0x5b7   :  { %v1005_v27 = vsel %vm524_vm4, %v1723_v26, 0.0 }
 0x5b8   :  { %1006 = vadd.xlane.f32.xlu0 %v1005_v27 }
 0x63d   :  { %v697_v34 = vpop.xlane.xlu0 %696 }
 0x641   :  { %v1238_v35 = vpop.xlane.xlu0 %1237 }
 0x642   :  { %v1239_v36 = vsub.f32 %v1235_v24, %v1238_v35 }
 0x644   :  { %v1240_v37 = vmul.f32 1.442695, %v1239_v36 }
 0x645   :  { %v1007_v60 = vpop.xlane.xlu0 %1006 }
 0x646   :  { %1724 = vpow2.f32 %v1240_v37 }
 0x647   :  { %1726 = vrcp.f32 %v697_v34 }
 0x648   :  { %1728 = vrcp.f32 %v1007_v60 }
 0x650   :  { %v1725_v40 = vpop.eup %1724 }
 0x651   :  { %1534 = vmatmul.mubr.msk.f32.vlgmr.msra.gmra.mrb[10].mxu0 %vm524_vm4, %v1725_v40  ;;  %v1242_v41 = vsel %vm524_vm4, %v1725_v40, 0.0  ;;  %v1727_v44 = vpop.eup %1726 }
 0x652   :  { %1243 = vadd.xlane.f32.xlu0 %v1242_v41  ;;  %v1729_v0 = vpop.eup %1728 }
 0x682   :  { %v767_v45 = vpop.f32.mrb[6].mxu1 }
 0x683   :  { %v772_v47 = vmul.f32 %v1727_v44, %v767_v45  ;;  %v1482_v49 = vpop.f32.mrb[7].mxu1 }
 0x685   :  { %1492 = vmatmul.mubr.msk.f32.vlgmr.msra.gmra.mrb[8].mxu1 %vm445_vm2, %v772_v47 }
 0x686   :  { %1683 = vmatpush3.bf16.msra.mxu1 %v1682_v46  ;;  %1502 = vmatprep.mubr.msk.f32.mxu1 %vm1757_vm1, %v1756_v7 }
 0x687   :  { %1684 = vmatprep.subr.bf16.mxu1 %v1761_v30 }
 0x68a   :  { %1686 = vmatpush3.bf16.msra.mxu1 %v1685_v52 }
 0x68b   :  { %1510 = vmatprep.subr.mxu1 %v1756_v7 }
 0x68d   :  { %1503 = vmatmul.mubr.msk.f32.vlgmr.msra.gmra.mrb[8].mxu1 %vm445_vm2, %v612_v48 }
 0x68e   :  { %1511 = vmatpush3.msra.mxu1 %v1009_v19  ;;  %1512 = vmatprep.mubr.msk.f32.mxu1 %vm1757_vm1, %v1756_v7 }
 0x68f   :  { %1687 = vmatprep.subr.bf16.mxu1 %v1761_v30 }
 0x691   :  { %1513 = vmatmul.mubr.msk.f32.vlgmr.msra.gmra.mrb[10].mxu1 %vm524_vm4, %v1723_v26 }
 0x692   :  { %1523 = vmatprep.mubr.msk.f32.mxu1 %vm1757_vm1, %v1756_v7  ;;  %1689 = vmatpush3.bf16.msra.mxu1 %v1688_v55 }
 0x693   :  { %1690 = vmatprep.subr.bf16.mxu1 %v1761_v30 }
 0x696   :  { %1692 = vmatpush3.bf16.msra.mxu1 %v1691_v38 }
 0x697   :  { %1693 = vmatprep.subr.bf16.mxu1 %v1761_v30 }
 0x6df   :  { %v1244_v61 = vpop.xlane.xlu0 %1243 }
 0x6e0   :  { %1730 = vrcp.f32 %v1244_v61 }
 0x6ea   :  { %v1731_v9 = vpop.eup %1730 }
 0x724   :  { %v1314_v58 = vpop.f32.mrb[10].mxu0 }
 0x725   :  { %v1535_v59 = vpop.f32.mrb[11].mxu0  ;;  %v1319_v10 = vmul.f32 %v1731_v9, %v1314_v58 }
 0x764   :  { %v1080_v1 = vpop.f32.mrb[10].mxu1 }
 0x765   :  { %v1085_v3 = vmul.f32 %v1729_v0, %v1080_v1  ;;  %v1514_v4 = vpop.f32.mrb[11].mxu1 }
 0x767   :  { %1524 = vmatmul.mubr.msk.f32.vlgmr.msra.gmra.mrb[8].mxu1 %vm445_vm2, %v1085_v3 }
 0x768   :  { %1695 = vmatpush3.bf16.msra.mxu1 %v1694_v2  ;;  %1544 = vmatprep.mubr.msk.f32.mxu1 %vm1757_vm1, %v1756_v7 }
 0x769   :  { %1696 = vmatprep.subr.bf16.mxu1 %v1761_v30 }
 0x76c   :  { %1698 = vmatpush3.bf16.msra.mxu1 %v1697_v8 }
 0x76f   :  { %1545 = vmatmul.mubr.msk.f32.vlgmr.msra.gmra.mrb[8].mxu1 %vm445_vm2, %v1319_v10 }
 0x842   :  { %v1389_v11 = vpop.f32.mrb[8].mxu1 }
 0x843   :  { %1394 = vst [vmem:[#allocation2] sm:$0xff] %v1389_v11  ;;  %v1546_v12 = vpop.f32.mrb[9].mxu1 }
 0x844   :  { %1743 = shalt.err (!%p1740_p4)
}
 0x845   :  { %s1744_s11 = scalar_lea.hbm %s2389_s9, 128 }
 0x846   :  { %p1745_p5 = scmp.ne.s32.totalorder %s2389_s9, %s1744_s11  ;;  %p1748_p6 = scmp.lt.u32.totalorder %s1744_s11, %s2389_s9 }
 0x848   :  { %p1750_p7 = pnand %p1748_p6, %p1745_p5 }
 0x84a   :  { %1753 = shalt.err (!%p1750_p7)
}
 0x84b   :  { %1404 = dma.vmem_to_hbm [thread:$0]  %s1402_s29, 128, %s2389_s9, [#allocation3]  }
 0x84c   :  { %1754 = dma.done.wait [#allocation3], 128  }
 0x84d   :  { %1755 = vsyncadd [#allocation3], 4294967168 }
 0x84e   :  { %1408 = vsyncpa [#allocation3], 1 }

</bundles_post_ra>
